<compile_context>
chip_gen: v5e
topology: v5e:2x2
jax: 0.10.0
libtpu: 0.0.40
codegen_flags: <defaults>
</compile_context>

<pallas_src>
import jax
import jax.numpy as jnp
from jax.experimental import pallas as pl
from jax.experimental.pallas import tpu as pltpu

LEAKY_SLOPE = 0.01   # nn.LeakyReLU default
BN_EPS = 1e-5        # nn.BatchNorm1d default
LANE = 128


def _leaky_relu(x):
    return jnp.where(x >= 0, x, LEAKY_SLOPE * x)


def _bn_train_apply(h, gamma, beta):
    # Training-mode BatchNorm1d over the batch axis (biased variance).
    # Re-associated: one fused (1, H) scale = rsqrt(var + eps) * gamma.
    mean = jnp.mean(h, axis=0, keepdims=True)
    d = h - mean
    var = jnp.mean(d * d, axis=0, keepdims=True)
    scale = jax.lax.rsqrt(var + BN_EPS) * gamma
    return d * scale + beta


def actor_kernel(x_ref,
                 w1_ref, g1_ref, be1_ref,
                 w2_ref, g2_ref, be2_ref,
                 w3_ref, b3_ref,
                 o_ref):
    wdt = w1_ref.dtype           # matmul dtype (f32 or bf16); accumulation is f32
    x = x_ref[...]

    # fc1 (bias dropped: exactly cancelled by BN1's batch-mean subtraction)
    h = jnp.dot(x, w1_ref[...], preferred_element_type=jnp.float32)
    h = _leaky_relu(_bn_train_apply(h, g1_ref[...], be1_ref[...]))

    # fc2 (bias dropped: cancelled by BN2)
    h = jnp.dot(h.astype(wdt), w2_ref[...], preferred_element_type=jnp.float32)
    h = _leaky_relu(_bn_train_apply(h, g2_ref[...], be2_ref[...]))

    # fc3 + bias + tanh
    h = jnp.dot(h.astype(wdt), w3_ref[...], preferred_element_type=jnp.float32)
    o_ref[...] = jnp.tanh(h + b3_ref[...])


def _round_up(n, m=LANE):
    return ((n + m - 1) // m) * m


def _pad_axis(a, target, axis, value=0.0):
    pad = target - a.shape[axis]
    if pad <= 0:
        return a
    widths = [(0, 0)] * a.ndim
    widths[axis] = (0, pad)
    return jnp.pad(a, widths, constant_values=value)


def actor_forward(x, params, matmul_dtype=jnp.float32):
    """x: (B, state_size) float32. params: dict of weights/biases/BN params.

    matmul_dtype: jnp.float32 (exact) or jnp.bfloat16 (MXU fast path).
    """
    B, S = x.shape
    H = params["w1"].shape[1]
    A = params["w3"].shape[1]
    Sp, Hp, Ap = _round_up(S), _round_up(H), _round_up(A)

    # Lane-dense padding (zero weights, gamma=1 / beta=0 on padded lanes).
    xp = _pad_axis(x, Sp, 1).astype(matmul_dtype)
    w1p = _pad_axis(_pad_axis(params["w1"], Sp, 0), Hp, 1).astype(matmul_dtype)
    w2p = _pad_axis(_pad_axis(params["w2"], Hp, 0), Hp, 1).astype(matmul_dtype)
    w3p = _pad_axis(_pad_axis(params["w3"], Hp, 0), Ap, 1).astype(matmul_dtype)
    g1p = _pad_axis(params["g1"], Hp, 1, 1.0)
    be1p = _pad_axis(params["be1"], Hp, 1, 0.0)
    g2p = _pad_axis(params["g2"], Hp, 1, 1.0)
    be2p = _pad_axis(params["be2"], Hp, 1, 0.0)
    b3p = _pad_axis(params["b3"], Ap, 1, 0.0)

    args = (xp, w1p, g1p, be1p, w2p, g2p, be2p, w3p, b3p)

    def full_spec(shape):
        # Whole array as a single block (grid has a single point).
        return pl.BlockSpec(shape, lambda: tuple(0 for _ in shape))

    flops = 2 * B * (Sp * Hp + Hp * Hp + Hp * Ap)
    transcendentals = B * Ap + 2 * Hp                      # tanh + two rsqrt vectors
    bytes_accessed = sum(int(a.size) * a.dtype.itemsize for a in args) + B * Ap * 4

    out = pl.pallas_call(
        actor_kernel,
        out_shape=jax.ShapeDtypeStruct((B, Ap), jnp.float32),
        grid_spec=pltpu.PrefetchScalarGridSpec(
            num_scalar_prefetch=0,
            grid=(),
            in_specs=[full_spec(a.shape) for a in args],
            out_specs=full_spec((B, Ap)),
        ),
        compiler_params=pltpu.CompilerParams(
            vmem_limit_bytes=32 * 1024 * 1024),
        cost_estimate=pl.CostEstimate(
            flops=flops,
            transcendentals=transcendentals,
            bytes_accessed=bytes_accessed),
    )(*args)

    return out[:, :A]


def init_params(key, state_size, hidden_size, action_size):
    """Deterministic synthetic init (uniform, PyTorch-Linear-like scale)."""
    ks = jax.random.split(key, 6)

    def lin(kw, kb, fan_in, fan_out):
        bound = 1.0 / jnp.sqrt(jnp.float32(fan_in))
        w = jax.random.uniform(kw, (fan_in, fan_out), jnp.float32, -bound, bound)
        b = jax.random.uniform(kb, (1, fan_out), jnp.float32, -bound, bound)
        return w, b

    w1, b1 = lin(ks[0], ks[1], state_size, hidden_size)
    w2, b2 = lin(ks[2], ks[3], hidden_size, hidden_size)
    w3, b3 = lin(ks[4], ks[5], hidden_size, action_size)

    return {
        "w1": w1, "b1": b1,
        "g1": jnp.ones((1, hidden_size), jnp.float32),
        "be1": jnp.zeros((1, hidden_size), jnp.float32),
        "w2": w2, "b2": b2,
        "g2": jnp.ones((1, hidden_size), jnp.float32),
        "be2": jnp.zeros((1, hidden_size), jnp.float32),
        "w3": w3, "b3": b3,
    }


def actor_reference(x, p):
    """Pure-JAX reference faithful to the PyTorch module (with fc biases)."""
    def bn(h, g, b):
        mean = jnp.mean(h, axis=0, keepdims=True)
        var = jnp.mean((h - mean) ** 2, axis=0, keepdims=True)
        return (h - mean) * jax.lax.rsqrt(var + BN_EPS) * g + b

    h = _leaky_relu(bn(x @ p["w1"] + p["b1"], p["g1"], p["be1"]))
    h = _leaky_relu(bn(h @ p["w2"] + p["b2"], p["g2"], p["be2"]))
    return jnp.tanh(h @ p["w3"] + p["b3"])


if __name__ == "__main__":
    key = jax.random.PRNGKey(0)
    k_x, k_p = jax.random.split(key)

    batch = 8
    state_size = 16
    hidden_size = 32
    action_size = 8

    x = jax.random.normal(k_x, (batch, state_size), dtype=jnp.float32)
    params = init_params(k_p, state_size, hidden_size, action_size)

    ref = actor_reference(x, params)

    # Exact (f32 matmul) path: bias-drop + padding are semantics-preserving.
    out = jax.block_until_ready(actor_forward(x, params, jnp.float32))
    assert out.shape == (batch, action_size)
    assert jnp.allclose(out, ref, atol=1e-4, rtol=1e-4), "f32 mismatch vs reference"

    # bf16-weight MXU fast path (v5e/v6e/v7x); f32 accumulate + f32 elementwise.
    out_bf16 = jax.block_until_ready(actor_forward(x, params, jnp.bfloat16))
    assert out_bf16.shape == (batch, action_size)
    assert jnp.allclose(out_bf16, ref, atol=1e-1, rtol=1e-1), "bf16 path diverged"

    print("KERNEL_OK")
</pallas_src>

<mosaic_0001>
module attributes {stable_mosaic.version = 11 : i64} {
  func.func @actor_kernel(%arg0: memref<8x128xf32, #tpu.memory_space<vmem>>, %arg1: memref<128x128xf32, #tpu.memory_space<vmem>>, %arg2: memref<1x128xf32, #tpu.memory_space<vmem>>, %arg3: memref<1x128xf32, #tpu.memory_space<vmem>>, %arg4: memref<128x128xf32, #tpu.memory_space<vmem>>, %arg5: memref<1x128xf32, #tpu.memory_space<vmem>>, %arg6: memref<1x128xf32, #tpu.memory_space<vmem>>, %arg7: memref<128x128xf32, #tpu.memory_space<vmem>>, %arg8: memref<1x128xf32, #tpu.memory_space<vmem>>, %arg9: memref<8x128xf32, #tpu.memory_space<vmem>>) attributes {dimension_semantics = [], scalar_prefetch = 0 : i64, scratch_operands = 0 : i64, tpu.core_type = #tpu.core_type<tc>} {
    %c0 = arith.constant 0 : index
    %c0_0 = arith.constant 0 : index
    %0 = vector.load %arg0[%c0, %c0_0] : memref<8x128xf32, #tpu.memory_space<vmem>>, vector<8x128xf32>
    %c0_1 = arith.constant 0 : index
    %c0_2 = arith.constant 0 : index
    %1 = vector.load %arg1[%c0_1, %c0_2] : memref<128x128xf32, #tpu.memory_space<vmem>>, vector<128x128xf32>
    %cst = arith.constant dense<0.000000e+00> : vector<8x128xf32>
    %2 = tpu.matmul %0, %1, %cst {dimension_numbers = #tpu.dot_dimension_numbers<[1], [0], [0], [1], [0, 0, 1, 1], [], []>} : vector<8x128xf32>, vector<128x128xf32>, vector<8x128xf32> -> vector<8x128xf32>
    %c0_3 = arith.constant 0 : index
    %c0_4 = arith.constant 0 : index
    %3 = vector.load %arg2[%c0_3, %c0_4] : memref<1x128xf32, #tpu.memory_space<vmem>>, vector<1x128xf32>
    %c0_5 = arith.constant 0 : index
    %c0_6 = arith.constant 0 : index
    %4 = vector.load %arg3[%c0_5, %c0_6] : memref<1x128xf32, #tpu.memory_space<vmem>>, vector<1x128xf32>
    %cst_7 = arith.constant dense<0.000000e+00> : vector<128xf32>
    %5 = vector.multi_reduction <add>, %2, %cst_7 [0] : vector<8x128xf32> to vector<128xf32>
    %6 = vector.shape_cast %5 : vector<128xf32> to vector<1x128xf32>
    %cst_8 = arith.constant 8.000000e+00 : f32
    %7 = vector.broadcast %cst_8 : f32 to vector<1x128xf32>
    %8 = arith.divf %6, %7 : vector<1x128xf32>
    %9 = vector.broadcast %8 : vector<1x128xf32> to vector<8x128xf32>
    %10 = arith.subf %2, %9 : vector<8x128xf32>
    %11 = arith.mulf %10, %10 : vector<8x128xf32>
    %cst_9 = arith.constant dense<0.000000e+00> : vector<128xf32>
    %12 = vector.multi_reduction <add>, %11, %cst_9 [0] : vector<8x128xf32> to vector<128xf32>
    %13 = vector.shape_cast %12 : vector<128xf32> to vector<1x128xf32>
    %cst_10 = arith.constant 8.000000e+00 : f32
    %14 = vector.broadcast %cst_10 : f32 to vector<1x128xf32>
    %15 = arith.divf %13, %14 : vector<1x128xf32>
    %cst_11 = arith.constant 9.99999974E-6 : f32
    %16 = vector.broadcast %cst_11 : f32 to vector<1x128xf32>
    %17 = arith.addf %15, %16 : vector<1x128xf32>
    %18 = math.rsqrt %17 : vector<1x128xf32>
    %19 = arith.mulf %18, %3 : vector<1x128xf32>
    %20 = vector.broadcast %19 : vector<1x128xf32> to vector<8x128xf32>
    %21 = arith.mulf %10, %20 : vector<8x128xf32>
    %22 = vector.broadcast %4 : vector<1x128xf32> to vector<8x128xf32>
    %23 = arith.addf %21, %22 : vector<8x128xf32>
    %cst_12 = arith.constant 0.000000e+00 : f32
    %24 = vector.broadcast %cst_12 : f32 to vector<8x128xf32>
    %25 = arith.cmpf oge, %23, %24 : vector<8x128xf32>
    %cst_13 = arith.constant 0.00999999977 : f32
    %26 = vector.broadcast %cst_13 : f32 to vector<8x128xf32>
    %27 = arith.mulf %26, %23 : vector<8x128xf32>
    %28 = arith.select %25, %23, %27 : vector<8x128xi1>, vector<8x128xf32>
    %c0_14 = arith.constant 0 : index
    %c0_15 = arith.constant 0 : index
    %29 = vector.load %arg4[%c0_14, %c0_15] : memref<128x128xf32, #tpu.memory_space<vmem>>, vector<128x128xf32>
    %cst_16 = arith.constant dense<0.000000e+00> : vector<8x128xf32>
    %30 = tpu.matmul %28, %29, %cst_16 {dimension_numbers = #tpu.dot_dimension_numbers<[1], [0], [0], [1], [0, 0, 1, 1], [], []>} : vector<8x128xf32>, vector<128x128xf32>, vector<8x128xf32> -> vector<8x128xf32>
    %c0_17 = arith.constant 0 : index
    %c0_18 = arith.constant 0 : index
    %31 = vector.load %arg5[%c0_17, %c0_18] : memref<1x128xf32, #tpu.memory_space<vmem>>, vector<1x128xf32>
    %c0_19 = arith.constant 0 : index
    %c0_20 = arith.constant 0 : index
    %32 = vector.load %arg6[%c0_19, %c0_20] : memref<1x128xf32, #tpu.memory_space<vmem>>, vector<1x128xf32>
    %cst_21 = arith.constant dense<0.000000e+00> : vector<128xf32>
    %33 = vector.multi_reduction <add>, %30, %cst_21 [0] : vector<8x128xf32> to vector<128xf32>
    %34 = vector.shape_cast %33 : vector<128xf32> to vector<1x128xf32>
    %cst_22 = arith.constant 8.000000e+00 : f32
    %35 = vector.broadcast %cst_22 : f32 to vector<1x128xf32>
    %36 = arith.divf %34, %35 : vector<1x128xf32>
    %37 = vector.broadcast %36 : vector<1x128xf32> to vector<8x128xf32>
    %38 = arith.subf %30, %37 : vector<8x128xf32>
    %39 = arith.mulf %38, %38 : vector<8x128xf32>
    %cst_23 = arith.constant dense<0.000000e+00> : vector<128xf32>
    %40 = vector.multi_reduction <add>, %39, %cst_23 [0] : vector<8x128xf32> to vector<128xf32>
    %41 = vector.shape_cast %40 : vector<128xf32> to vector<1x128xf32>
    %cst_24 = arith.constant 8.000000e+00 : f32
    %42 = vector.broadcast %cst_24 : f32 to vector<1x128xf32>
    %43 = arith.divf %41, %42 : vector<1x128xf32>
    %cst_25 = arith.constant 9.99999974E-6 : f32
    %44 = vector.broadcast %cst_25 : f32 to vector<1x128xf32>
    %45 = arith.addf %43, %44 : vector<1x128xf32>
    %46 = math.rsqrt %45 : vector<1x128xf32>
    %47 = arith.mulf %46, %31 : vector<1x128xf32>
    %48 = vector.broadcast %47 : vector<1x128xf32> to vector<8x128xf32>
    %49 = arith.mulf %38, %48 : vector<8x128xf32>
    %50 = vector.broadcast %32 : vector<1x128xf32> to vector<8x128xf32>
    %51 = arith.addf %49, %50 : vector<8x128xf32>
    %cst_26 = arith.constant 0.000000e+00 : f32
    %52 = vector.broadcast %cst_26 : f32 to vector<8x128xf32>
    %53 = arith.cmpf oge, %51, %52 : vector<8x128xf32>
    %cst_27 = arith.constant 0.00999999977 : f32
    %54 = vector.broadcast %cst_27 : f32 to vector<8x128xf32>
    %55 = arith.mulf %54, %51 : vector<8x128xf32>
    %56 = arith.select %53, %51, %55 : vector<8x128xi1>, vector<8x128xf32>
    %c0_28 = arith.constant 0 : index
    %c0_29 = arith.constant 0 : index
    %57 = vector.load %arg7[%c0_28, %c0_29] : memref<128x128xf32, #tpu.memory_space<vmem>>, vector<128x128xf32>
    %cst_30 = arith.constant dense<0.000000e+00> : vector<8x128xf32>
    %58 = tpu.matmul %56, %57, %cst_30 {dimension_numbers = #tpu.dot_dimension_numbers<[1], [0], [0], [1], [0, 0, 1, 1], [], []>} : vector<8x128xf32>, vector<128x128xf32>, vector<8x128xf32> -> vector<8x128xf32>
    %c0_31 = arith.constant 0 : index
    %c0_32 = arith.constant 0 : index
    %59 = vector.load %arg8[%c0_31, %c0_32] : memref<1x128xf32, #tpu.memory_space<vmem>>, vector<1x128xf32>
    %60 = vector.broadcast %59 : vector<1x128xf32> to vector<8x128xf32>
    %61 = arith.addf %58, %60 : vector<8x128xf32>
    %62 = math.tanh %61 : vector<8x128xf32>
    %c0_33 = arith.constant 0 : index
    %c0_34 = arith.constant 0 : index
    %63 = vector.load %arg9[%c0_33, %c0_34] : memref<8x128xf32, #tpu.memory_space<vmem>>, vector<8x128xf32>
    tpu.vector_store %arg9[%c0_33, %c0_34], %62 {strides = array<i32>} : memref<8x128xf32, #tpu.memory_space<vmem>>, vector<8x128xf32>,
    return
  }
}

</mosaic_0001>

<bundles_post_ra>
// kernel: tpu_custom_call.1
= control target key start
LH: loop header
LB: loop body
LE: loop exit
PB: predicated region body
PF: predicated region fallthrough
CT: control target
= control target key end

     0   :  { %14 = vsyncpa [#allocation3], 0  ;;  %s554_s0 = inlined_call_operand.hbm [shape: f32[8,128], index: 0, kind: input, shape index: {}]   ;;  %s555_s1 = inlined_call_operand.hbm [shape: f32[128,128], index: 1, kind: input, shape index: {}]   ;;  %s556_s2 = inlined_call_operand.vmem [shape: f32[1,128], index: 2, kind: input, shape index: {}]   ;;  %s557_s3 = inlined_call_operand.vmem [shape: f32[1,128], index: 3, kind: input, shape index: {}]   ;;  %s558_s4 = inlined_call_operand.hbm [shape: f32[128,128], index: 4, kind: input, shape index: {}]   ;;  %s559_s5 = inlined_call_operand.vmem [shape: f32[1,128], index: 5, kind: input, shape index: {}]   ;;  %s560_s6 = inlined_call_operand.vmem [shape: f32[1,128], index: 6, kind: input, shape index: {}]   ;;  %s561_s7 = inlined_call_operand.hbm [shape: f32[128,128], index: 7, kind: input, shape index: {}]   ;;  %s562_s8 = inlined_call_operand.vmem [shape: f32[1,128], index: 8, kind: input, shape index: {}]   ;;  %s563_s9 = inlined_call_operand.hbm [shape: f32[8,128], index: 9, kind: output, shape index: {}]  }
   0x1   :  { %15 = vsyncpa [#allocation6], 0 }
   0x2   :  { %16 = vsyncpa [#allocation9], 0  ;;  %s33_s11 = sshll.u32 %s555_s1, 4  ;;  %s34_s11 = int_to_ptr.hbm [resolvable:$true] %s33_s11 }
   0x3   :  { %17 = vsyncpa [#allocation4], 0  ;;  %s460_s12 = smov [#allocation5]   ;;  %s23_s16 = sshll.u32 %s554_s0, 4  ;;  %s24_s16 = int_to_ptr.hbm [resolvable:$true] %s23_s16 }
   0x4   :  { %s35_s13 = sshll.u32 %s460_s12, 4  ;;  %s461_s17 = smov 128   ;;  %s36_s13 = int_to_ptr.vmem [resolvable:$true] %s35_s13 }
   0x5   :  { %s462_s18 = smov 8   ;;  %s463_s19 = smov [#allocation2]  }
   0x6   :  { %41 = dma.hbm_to_vmem [thread:$0]  %s34_s11, 2048, %s36_s13, [#allocation6], %s461_s17, %s461_s17, %s462_s18  }
   0x7   :  { %s25_s20 = sshll.u32 %s463_s19, 4  ;;  %s50_s23 = sshll.u32 %s558_s4, 4  ;;  %s26_s20 = int_to_ptr.vmem [resolvable:$true] %s25_s20  ;;  %s51_s23 = int_to_ptr.hbm [resolvable:$true] %s50_s23 }
   0x8   :  { %28 = dma.hbm_to_vmem [thread:$0]  %s24_s16, 128, %s26_s20, [#allocation3]  }
   0x9   :  { %s67_s25 = sshll.u32 %s561_s7, 4  ;;  %s464_s26 = smov [#allocation7]   ;;  %s68_s25 = int_to_ptr.hbm [resolvable:$true] %s67_s25 }
   0xa   :  { %s52_s27 = sshll.u32 %s464_s26, 4  ;;  %s465_s0 = smov [#allocation8]   ;;  %s53_s27 = int_to_ptr.vmem [resolvable:$true] %s52_s27 }
   0xb   :  { %58 = dma.hbm_to_vmem [thread:$0]  %s51_s23, 2048, %s53_s27, [#allocation6], %s461_s17, %s461_s17, %s462_s18  }
   0xc   :  { %s69_s28 = sshll.u32 %s465_s0, 4  ;;  %s70_s28 = int_to_ptr.vmem [resolvable:$true] %s69_s28 }
   0xd   :  { %75 = dma.hbm_to_vmem [thread:$0]  %s68_s25, 2048, %s70_s28, [#allocation9], %s461_s17, %s461_s17, %s462_s18  }
   0xe   :  { %452 = dma.done.wait [#allocation3], 128  }
   0xf   :  { %453 = vsyncadd [#allocation3], 4294967168 }
  0x10   :  { %454 = dma.done.wait [#allocation6], 4096  }
  0x11   :  { %455 = vsyncadd [#allocation6], 4294963200 }
  0x12   :  { %456 = dma.done.wait [#allocation9], 2048  }
  0x13   :  { %457 = vsyncadd [#allocation9], 4294965248  ;;  %v110_v0 = vld [vmem:[#allocation5 + $0x78] sm:$0xff]  ;;  %v109_v1 = vld [vmem:[#allocation5 + $0x70] sm:$0xff]  ;;  %v466_v17 = vmov 8.0   ;;  %s301_s17 = sshll.u32 %s563_s9, 4  ;;  %s302_s17 = int_to_ptr.hbm [resolvable:$true] %s301_s17 }
  0x14   :  { %111 = vmatpush.msra.mxu0 %v110_v0  ;;  %v108_v2 = vld [vmem:[#allocation5 + $0x68] sm:$0xff]  ;;  %v107_v3 = vld [vmem:[#allocation5 + $0x60] sm:$0xff]  ;;  %v106_v4 = vld [vmem:[#allocation5 + $0x58] sm:$0xff]  ;;  %324 = vrcp.f32 %v466_v17 }
  0x15   :  { %v105_v5 = vld [vmem:[#allocation5 + $0x50] sm:$0xff]  ;;  %v104_v6 = vld [vmem:[#allocation5 + $0x48] sm:$0xff]  ;;  %v103_v7 = vld [vmem:[#allocation5 + $0x40] sm:$0xff] }
  0x16   :  { %112 = vmatpush.msra.mxu0 %v109_v1  ;;  %v102_v8 = vld [vmem:[#allocation5 + $0x38] sm:$0xff]  ;;  %v101_v9 = vld [vmem:[#allocation5 + $0x30] sm:$0xff]  ;;  %v100_v10 = vld [vmem:[#allocation5 + $0x28] sm:$0xff] }
  0x17   :  { %v99_v11 = vld [vmem:[#allocation5 + $0x20] sm:$0xff]  ;;  %v98_v12 = vld [vmem:[#allocation5 + $0x18] sm:$0xff]  ;;  %v97_v13 = vld [vmem:[#allocation5 + $0x10] sm:$0xff] }
  0x18   :  { %113 = vmatpush.msra.mxu0 %v108_v2  ;;  %v96_v14 = vld [vmem:[#allocation5 + $0x8] sm:$0xff]  ;;  %v95_v15 = vld [vmem:[#allocation5] sm:$0xff]  ;;  %v94_v16 = vld [vmem:[#allocation2] sm:$0xff] }
  0x19   :  { %v192_v22 = vld [vmem:[#allocation7 + $0x78] sm:$0xff]  ;;  %v191_v25 = vld [vmem:[#allocation7 + $0x70] sm:$0xff]  ;;  %v190_v27 = vld [vmem:[#allocation7 + $0x68] sm:$0xff] }
  0x1a   :  { %114 = vmatpush.msra.mxu0 %v107_v3  ;;  %v325_v18 = vpop.eup %324  ;;  %193 = vmatpush.msra.mxu1 %v192_v22  ;;  %v189_v30 = vld [vmem:[#allocation7 + $0x60] sm:$0xff]  ;;  %v188_v32 = vld [vmem:[#allocation7 + $0x58] sm:$0xff]  ;;  %v187_v35 = vld [vmem:[#allocation7 + $0x50] sm:$0xff] }
  0x1b   :  { %v140_v19 = vmul.f32 8.0, %v325_v18  ;;  %vm144_vm0 = vweird.f32 %v325_v18  ;;  %v186_v37 = vld [vmem:[#allocation7 + $0x48] sm:$0xff]  ;;  %v185_v39 = vld [vmem:[#allocation7 + $0x40] sm:$0xff]  ;;  %v184_v41 = vld [vmem:[#allocation7 + $0x38] sm:$0xff] }
  0x1c   :  { %115 = vmatpush.msra.mxu0 %v106_v4  ;;  %194 = vmatpush.msra.mxu1 %v191_v25  ;;  %v183_v43 = vld [vmem:[#allocation7 + $0x30] sm:$0xff]  ;;  %v182_v45 = vld [vmem:[#allocation7 + $0x28] sm:$0xff]  ;;  %v181_v47 = vld [vmem:[#allocation7 + $0x20] sm:$0xff] }
  0x1d   :  { %v141_v20 = vsub.f32 1.0, %v140_v19  ;;  %v180_v49 = vld [vmem:[#allocation7 + $0x18] sm:$0xff]  ;;  %v179_v51 = vld [vmem:[#allocation7 + $0x10] sm:$0xff]  ;;  %v178_v52 = vld [vmem:[#allocation7 + $0x8] sm:$0xff] }
  0x1e   :  { %116 = vmatpush.msra.mxu0 %v105_v5  ;;  %195 = vmatpush.msra.mxu1 %v190_v27  ;;  %v177_v54 = vld [vmem:[#allocation7] sm:$0xff]  ;;  %v131_v63 = vld [vmem:[%s556_s2] sm:$0x1]  ;;  %v261_v22 = vld [vmem:[#allocation8 + $0x48] sm:$0xff] }
  0x1f   :  { %v142_v24 = vmul.f32 %v325_v18, %v141_v20  ;;  %v321_v4 = vld [vmem:[%s557_s3] ss:$0 sm:$0xff]  ;;  %v262_v20 = vld [vmem:[#allocation8 + $0x50] sm:$0xff] }
  0x20   :  { %117 = vmatpush.msra.mxu0 %v104_v6  ;;  %196 = vmatpush.msra.mxu1 %v189_v30  ;;  %v257_v30 = vld [vmem:[#allocation8 + $0x28] sm:$0xff] }
  0x21   :  { %v143_v29 = vadd.f32 %v325_v18, %v142_v24  ;;  %v260_v24 = vld [vmem:[#allocation8 + $0x40] sm:$0xff] }
  0x22   :  { %118 = vmatpush.msra.mxu0 %v103_v7  ;;  %197 = vmatpush.msra.mxu1 %v188_v32  ;;  %v256_v32 = vld [vmem:[#allocation8 + $0x20] sm:$0xff] }
  0x23   :  { %v530_v34 = vsel %vm144_vm0, %v325_v18, %v143_v29  ;;  %v263_v18 = vld [vmem:[#allocation8 + $0x58] sm:$0xff] }
  0x24   :  { %119 = vmatpush.msra.mxu0 %v102_v8  ;;  %198 = vmatpush.msra.mxu1 %v187_v35  ;;  %v255_v35 = vld [vmem:[#allocation8 + $0x18] sm:$0xff] }
  0x26   :  { %120 = vmatpush.msra.mxu0 %v101_v9  ;;  %199 = vmatpush.msra.mxu1 %v186_v37  ;;  %v254_v37 = vld [vmem:[#allocation8 + $0x10] sm:$0xff] }
  0x28   :  { %121 = vmatpush.msra.mxu0 %v100_v10  ;;  %200 = vmatpush.msra.mxu1 %v185_v39  ;;  %v267_v10 = vld [vmem:[#allocation8 + $0x78] sm:$0xff] }
  0x29   :  { %272 = vmatpush.msra.mxu2 %v267_v10 }
  0x2a   :  { %122 = vmatpush.msra.mxu0 %v99_v11  ;;  %201 = vmatpush.msra.mxu1 %v184_v41 }
  0x2c   :  { %123 = vmatpush.msra.mxu0 %v98_v12  ;;  %202 = vmatpush.msra.mxu1 %v183_v43  ;;  %v266_v12 = vld [vmem:[#allocation8 + $0x70] sm:$0xff] }
  0x2d   :  { %273 = vmatpush.msra.mxu2 %v266_v12 }
  0x2e   :  { %124 = vmatpush.msra.mxu0 %v97_v13  ;;  %203 = vmatpush.msra.mxu1 %v182_v45 }
  0x30   :  { %125 = vmatpush.msra.mxu0 %v96_v14  ;;  %204 = vmatpush.msra.mxu1 %v181_v47  ;;  %v265_v14 = vld [vmem:[#allocation8 + $0x68] sm:$0xff] }
  0x31   :  { %274 = vmatpush.msra.mxu2 %v265_v14 }
  0x32   :  { %126 = vmatpush.msra.mxu0 %v95_v15  ;;  %205 = vmatpush.msra.mxu1 %v180_v49  ;;  %v213_v49 = vld [vmem:[%s559_s5] sm:$0x1]  ;;  %s467_s5 = smov [#allocation10]  }
  0x33   :  { %127 = vmatmul.f32.vlgmr.msra.gmra.mxu0 %v94_v16  ;;  %v264_v16 = vld [vmem:[#allocation8 + $0x60] sm:$0xff]  ;;  %s299_s14 = sshll.u32 %s467_s5, 4  ;;  %s300_s14 = int_to_ptr.vmem [resolvable:$true] %s299_s14 }
  0x34   :  { %206 = vmatpush.msra.mxu1 %v179_v51  ;;  %275 = vmatpush.msra.mxu2 %v264_v16 }
  0x36   :  { %207 = vmatpush.msra.mxu1 %v178_v52  ;;  %276 = vmatpush.msra.mxu2 %v263_v18 }
  0x38   :  { %208 = vmatpush.msra.mxu1 %v177_v54  ;;  %277 = vmatpush.msra.mxu2 %v262_v20 }
  0x3a   :  { %278 = vmatpush.msra.mxu2 %v261_v22 }
  0x3c   :  { %279 = vmatpush.msra.mxu2 %v260_v24 }
  0xb0   :  { %v128_v21 = vpop.f32.mrf.mxu0 }
  0xb1   :  { %v133_v23 = vrot.slane %v128_v21, 4 }
  0xb3   :  { %v134_v26 = vadd.f32 %v133_v23, %v128_v21 }
  0xb5   :  { %v135_v28 = vrot.slane %v134_v26, 2 }
  0xb7   :  { %v136_v31 = vadd.f32 %v135_v28, %v134_v26  ;;  %v259_v26 = vld [vmem:[#allocation8 + $0x38] sm:$0xff]  ;;  %v258_v28 = vld [vmem:[#allocation8 + $0x30] sm:$0xff] }
  0xb8   :  { %280 = vmatpush.msra.mxu2 %v259_v26 }
  0xb9   :  { %v137_v33 = vrot.slane %v136_v31, 1 }
  0xba   :  { %281 = vmatpush.msra.mxu2 %v258_v28 }
  0xbb   :  { %v138_v36 = vadd.f32 %v137_v33, %v136_v31 }
  0xbc   :  { %282 = vmatpush.msra.mxu2 %v257_v30 }
  0xbd   :  { %v146_v38 = vmul.f32 %v530_v34, %v138_v36 }
  0xbe   :  { %283 = vmatpush.msra.mxu2 %v256_v32 }
  0xbf   :  { %v147_v40 = vsub.f32 %v128_v21, %v146_v38  ;;  %v253_v38 = vld [vmem:[#allocation8 + $0x8] sm:$0xff] }
  0xc0   :  { %284 = vmatpush.msra.mxu2 %v255_v35 }
  0xc1   :  { %v148_v42 = vmul.f32 %v147_v40, %v147_v40 }
  0xc2   :  { %285 = vmatpush.msra.mxu2 %v254_v37 }
  0xc3   :  { %v149_v44 = vrot.slane %v148_v42, 4 }
  0xc4   :  { %286 = vmatpush.msra.mxu2 %v253_v38 }
  0xc5   :  { %v150_v46 = vadd.f32 %v149_v44, %v148_v42 }
  0xc7   :  { %v151_v48 = vrot.slane %v150_v46, 2 }
  0xc9   :  { %v152_v50 = vadd.f32 %v151_v48, %v150_v46 }
  0xcb   :  { %v153_v53 = vrot.slane %v152_v50, 1 }
  0xcd   :  { %v154_v55 = vadd.f32 %v153_v53, %v152_v50 }
  0xcf   :  { %v155_v56 = vmul.f32 %v154_v55, %v530_v34 }
  0xd1   :  { %v156_v57 = vadd.f32 1e-05, %v155_v56 }
  0xd3   :  { %326 = vrsqrt.f32 %v156_v57  ;;  %vm163_vm2 = vweird.f32 %v156_v57 }
  0xd9   :  { %v327_v58 = vpop.eup %326 }
  0xda   :  { %v158_v59 = vmul.f32 %v327_v58, %v156_v57  ;;  %vm164_vm1 = vweird.f32 %v327_v58 }
  0xdb   :  { %vm165_vm3 = vmor %vm163_vm2, %vm164_vm1 }
  0xdc   :  { %v159_v60 = vmul.f32 %v327_v58, %v158_v59 }
  0xde   :  { %v160_v61 = vmul.f32 0.5, %v159_v60 }
  0xe0   :  { %v161_v62 = vsub.f32 1.5, %v160_v61 }
  0xe2   :  { %v162_v0 = vmul.f32 %v327_v58, %v161_v62 }
  0xe4   :  { %v166_v1 = vsel %vm165_vm3, %v327_v58, %v162_v0  ;;  %v323_v58 = vld [vmem:[%s562_s8] ss:$0 sm:$0xff] }
  0xe5   :  { %v167_v2 = vmul.f32 %v166_v1, %v131_v63 }
  0xe7   :  { %v168_v3 = vperm.slane %v167_v2, 0 }
  0xe9   :  { %v169_v5 = vmul.f32 %v168_v3, %v147_v40  ;;  %v252_v40 = vld [vmem:[#allocation8] sm:$0xff] }
  0xea   :  { %287 = vmatpush.msra.mxu2 %v252_v40 }
  0xeb   :  { %v173_v6 = vadd.f32 %v321_v4, %v169_v5 }
  0xed   :  { %vm174_vm4 = vcmp.ge.f32.partialorder %v173_v6, 0.0  ;;  %v175_v7 = vmul.f32 0.01, %v173_v6 }
  0xef   :  { %v176_v8 = vsel %vm174_vm4, %v173_v6, %v175_v7 }
  0xf0   :  { %209 = vmatmul.f32.vlgmr.msra.gmra.mxu1 %v176_v8 }
 0x16d   :  { %v210_v9 = vpop.f32.mrf.mxu1 }
 0x16e   :  { %v215_v11 = vrot.slane %v210_v9, 4 }
 0x170   :  { %v216_v13 = vadd.f32 %v215_v11, %v210_v9 }
 0x172   :  { %v217_v15 = vrot.slane %v216_v13, 2 }
 0x174   :  { %v218_v17 = vadd.f32 %v217_v15, %v216_v13 }
 0x176   :  { %v219_v19 = vrot.slane %v218_v17, 1 }
 0x178   :  { %v220_v21 = vadd.f32 %v219_v19, %v218_v17 }
 0x17a   :  { %v221_v23 = vmul.f32 %v220_v21, %v530_v34 }
 0x17c   :  { %v222_v25 = vsub.f32 %v210_v9, %v221_v23 }
 0x17e   :  { %v223_v27 = vmul.f32 %v222_v25, %v222_v25 }
 0x180   :  { %v224_v29 = vrot.slane %v223_v27, 4 }
 0x182   :  { %v225_v31 = vadd.f32 %v224_v29, %v223_v27 }
 0x184   :  { %v226_v33 = vrot.slane %v225_v31, 2 }
 0x186   :  { %v227_v36 = vadd.f32 %v226_v33, %v225_v31 }
 0x188   :  { %v228_v39 = vrot.slane %v227_v36, 1 }
 0x18a   :  { %v229_v41 = vadd.f32 %v228_v39, %v227_v36 }
 0x18c   :  { %v230_v42 = vmul.f32 %v229_v41, %v530_v34  ;;  %v322_v34 = vld [vmem:[%s560_s6] ss:$0 sm:$0xff] }
 0x18e   :  { %v231_v43 = vadd.f32 1e-05, %v230_v42 }
 0x190   :  { %328 = vrsqrt.f32 %v231_v43  ;;  %vm238_vm6 = vweird.f32 %v231_v43 }
 0x196   :  { %v329_v44 = vpop.eup %328 }
 0x197   :  { %v233_v45 = vmul.f32 %v329_v44, %v231_v43  ;;  %vm239_vm5 = vweird.f32 %v329_v44 }
 0x198   :  { %vm240_vm7 = vmor %vm238_vm6, %vm239_vm5 }
 0x199   :  { %v234_v46 = vmul.f32 %v329_v44, %v233_v45 }
 0x19b   :  { %v235_v47 = vmul.f32 0.5, %v234_v46 }
 0x19d   :  { %v236_v48 = vsub.f32 1.5, %v235_v47 }
 0x19f   :  { %v237_v50 = vmul.f32 %v329_v44, %v236_v48 }
 0x1a1   :  { %v241_v51 = vsel %vm240_vm7, %v329_v44, %v237_v50 }
 0x1a2   :  { %v242_v52 = vmul.f32 %v241_v51, %v213_v49 }
 0x1a4   :  { %v243_v53 = vperm.slane %v242_v52, 0 }
 0x1a6   :  { %v244_v54 = vmul.f32 %v243_v53, %v222_v25 }
 0x1a8   :  { %v248_v55 = vadd.f32 %v322_v34, %v244_v54 }
 0x1aa   :  { %vm249_vm8 = vcmp.ge.f32.partialorder %v248_v55, 0.0  ;;  %v250_v56 = vmul.f32 0.01, %v248_v55 }
 0x1ac   :  { %v251_v57 = vsel %vm249_vm8, %v248_v55, %v250_v56 }
 0x1ad   :  { %288 = vmatmul.f32.vlgmr.msra.gmra.mxu2 %v251_v57 }
 0x230   :  { %v289_v59 = vpop.f32.mrf.mxu2 }
 0x231   :  { %v290_v60 = vadd.f32 %v323_v58, %v289_v59 }
 0x233   :  { %330 = vtanh.f32 %v290_v60 }
 0x239   :  { %v331_v61 = vpop.eup %330 }
 0x23a   :  { %293 = vst [vmem:[#allocation10] sm:$0xff] %v331_v61 }
 0x23b   :  { %304 = dma.vmem_to_hbm [thread:$0]  %s300_s14, 128, %s302_s17, [#allocation4]  }
 0x23c   :  { %458 = dma.done.wait [#allocation4], 128  }
 0x23d   :  { %459 = vsyncadd [#allocation4], 4294967168 }
 0x23e   :  { %309 = vsyncpa [#allocation3], 1 }
 0x23f   :  { %310 = vsyncpa [#allocation6], 1 }
 0x240   :  { %311 = vsyncpa [#allocation9], 1 }
 0x241   :  { %312 = vsyncpa [#allocation4], 1 }

</bundles_post_ra>
